<compile_context>
chip_gen: v7x
topology: tpu7x:2x2x1
jax: 0.10.0
libtpu: 0.0.40
codegen_flags: <defaults>
</compile_context>

<pallas_src>
import jax
import jax.numpy as jnp
from jax import lax
from jax.experimental import pallas as pl
from jax.experimental.pallas import tpu as pltpu


# ~48 MiB scoped VMEM: enough for double-buffered in+out at the block target
# below with headroom under v7x's 64 MiB physical VMEM (v5e/v6e have 128 MiB
# physical, so this only raises their 16/32 MiB scoped defaults).
_VMEM_LIMIT_BYTES = 48 * 1024 * 1024
# Per-input-block byte target.  Double-buffered in+out => ~4x this in VMEM.
# Large enough that the ~0.35 us per-grid-step overhead is a few percent of a
# step even at v7x's 3.2 TB/s HBM.
_TARGET_BLOCK_BYTES = 4 * 1024 * 1024


def _make_normalize_kernel(power: int):
    inv_p = 1.0 / float(power)

    def kernel(x_ref, o_ref):
        # Block is (TN, C, S) or (TN, C, TH, W); reduction is over axis=1 (C).
        x_native = x_ref[...]
        x = x_native.astype(jnp.float32)

        if power == 2:
            # x*x stays on the VPU; rsqrt goes to the EUP on the reduced
            # (1/C-sized) array only.
            s = jnp.sum(x * x, axis=1, keepdims=True)
            inv = lax.rsqrt(s)
        else:
            # TODO(synk): matches the literal module (x.pow(p), no abs); like
            # PyTorch this yields NaN for odd p with a negative channel sum.
            s = jnp.sum(lax.integer_pow(x, power), axis=1, keepdims=True)
            inv = jnp.exp((-inv_p) * jnp.log(s))

        # TODO(synk): no eps clamp, exactly like the reference module -- an
        # all-zero channel vector produces Inf/NaN just as in PyTorch.
        if o_ref.dtype == jnp.float32:
            o_ref[...] = x * inv
        else:
            # bf16/f16 inputs: accumulate in f32 (above) but do the bulk scale
            # in the native dtype -- halves vreg / load-store pressure on the
            # bf16-capable VPUs (v6e/v7x).
            o_ref[...] = x_native * inv.astype(o_ref.dtype)

    return kernel


def _round_up(x: int, m: int) -> int:
    return ((x + m - 1) // m) * m


def _plan_tiling(N, C, H, W, itemsize):
    """Pick (mode, TN, spatial_tile).

    mode "3d": blocks are (TN, C, sp_tile) over a (N, C, H*W) view.
    mode "4d": blocks are (TN, C, sp_tile, W) over the NCHW array (used only
               when H*W has no usable multiple-of-128 divisor, so we never
               need to pad + re-slice -- which would double HBM traffic).
    Budget math includes sublane (8) / lane (128) layout padding so the
    double-buffered footprint respects VMEM on all generations.
    """
    HW = H * W
    C_pad = _round_up(C, 8)                       # sublane padding, 3-D layout
    W_pad = max(_round_up(W, 128), 128)

    def bytes_3d(hw):                             # per TN=1, layout-padded
        return C_pad * max(_round_up(hw, 128), 128) * itemsize

    def bytes_4d(th):
        return C * _round_up(th, 8) * W_pad * itemsize

    if bytes_3d(HW) <= _TARGET_BLOCK_BYTES:
        # 1) Full spatial extent per block (no (8,128) constraint on
        #    full-extent dims, no padding, lane-dense whenever HW % 128 == 0).
        mode, sp_tile, per_n_bytes = "3d", HW, bytes_3d(HW)
    else:
        # 2) Largest multiple-of-128 divisor of HW that fits the budget.
        hw_cap = (_TARGET_BLOCK_BYTES // (C_pad * itemsize)) // 128 * 128
        hw_tile = None
        d = min(hw_cap, (HW // 128) * 128)
        while d >= 128:
            if HW % d == 0:
                hw_tile = d
                break
            d -= 128
        if hw_tile is None and HW % 128 == 0:
            hw_tile = 128                         # minimum lane tile (huge-C case)
        if hw_tile is not None:
            mode, sp_tile, per_n_bytes = "3d", hw_tile, bytes_3d(hw_tile)
        else:
            # 3) No usable divisor of HW: tile over H with W kept full-extent
            #    as the lane dim instead of padding.
            cands = [d for d in range(1, H + 1)
                     if H % d == 0 and (d % 8 == 0 or d == H)]
            fitting = [d for d in cands if bytes_4d(d) <= _TARGET_BLOCK_BYTES]
            th = max(fitting) if fitting else min(cands)
            mode, sp_tile, per_n_bytes = "4d", th, bytes_4d(th)

    # Batch several N per block to amortize per-step overhead on tiny tiles.
    tn = max(1, min(N, _TARGET_BLOCK_BYTES // max(per_n_bytes, 1)))
    while N % tn != 0:
        tn -= 1

    n_sp_steps = (HW // sp_tile) if mode == "3d" else (H // sp_tile)
    # Keep >=2 independent grid steps when possible so both TensorCores on a
    # v7x megacore get work (both grid axes are "parallel").
    if (N // tn) * n_sp_steps < 2 and N >= 2:
        tn = N // 2
        while N % tn != 0:
            tn -= 1

    return mode, tn, sp_tile


def normalize(x: jax.Array, power: int = 2) -> jax.Array:
    """L_p normalization over dim 1 of an NCHW tensor (PyTorch `Normalize`)."""
    N, C, H, W = x.shape
    HW = H * W
    itemsize = jnp.dtype(x.dtype).itemsize
    mode, TN, sp_tile = _plan_tiling(N, C, H, W, itemsize)

    kernel = _make_normalize_kernel(power)
    cparams = pltpu.CompilerParams(
        # The reduction (over C) lives entirely inside one block, so both grid
        # axes are independent -> shardable across TensorCores.
        dimension_semantics=("parallel", "parallel"),
        vmem_limit_bytes=_VMEM_LIMIT_BYTES,
    )

    if mode == "3d":
        x3 = x.reshape(N, C, HW)
        grid = (N // TN, HW // sp_tile)
        out = pl.pallas_call(
            kernel,
            out_shape=jax.ShapeDtypeStruct((N, C, HW), x.dtype),
            grid_spec=pltpu.PrefetchScalarGridSpec(
                num_scalar_prefetch=0,
                grid=grid,
                in_specs=[pl.BlockSpec((TN, C, sp_tile), lambda n, s: (n, 0, s))],
                out_specs=pl.BlockSpec((TN, C, sp_tile), lambda n, s: (n, 0, s)),
            ),
            compiler_params=cparams,
        )(x3)
        return out.reshape(N, C, H, W)

    # mode == "4d": tile over H, W stays full-extent as the lane dim.
    grid = (N // TN, H // sp_tile)
    out = pl.pallas_call(
        kernel,
        out_shape=jax.ShapeDtypeStruct((N, C, H, W), x.dtype),
        grid_spec=pltpu.PrefetchScalarGridSpec(
            num_scalar_prefetch=0,
            grid=grid,
            in_specs=[pl.BlockSpec((TN, C, sp_tile, W), lambda n, h: (n, 0, h, 0))],
            out_specs=pl.BlockSpec((TN, C, sp_tile, W), lambda n, h: (n, 0, h, 0)),
        ),
        compiler_params=cparams,
    )(x)
    return out


if __name__ == "__main__":
    key = jax.random.PRNGKey(0)
    # Small NCHW feature map: batch=2, channels=4, 16x16 spatial.
    x = jax.random.normal(key, (2, 4, 16, 16), dtype=jnp.float32)

    out = normalize(x, power=2)
    out = jax.block_until_ready(out)

    # Silent correctness check against a pure-JAX reference of the PyTorch forward.
    ref = x / jnp.power(jnp.sum(jnp.power(x, 2), axis=1, keepdims=True), 0.5)
    assert out.shape == x.shape and out.dtype == x.dtype
    assert jnp.allclose(out, ref, atol=1e-5, rtol=1e-5)

    print("KERNEL_OK")
</pallas_src>

<mosaic_0001>
module attributes {stable_mosaic.version = 11 : i64} {
  func.func @kernel(%arg0: i32, %arg1: i32, %arg2: memref<1x4x256xf32, #tpu.memory_space<vmem>>, %arg3: memref<1x4x256xf32, #tpu.memory_space<vmem>>) attributes {dimension_semantics = [#tpu.dimension_semantics<parallel>, #tpu.dimension_semantics<parallel>], iteration_bounds = array<i64: 2, 1>, scalar_prefetch = 0 : i64, scratch_operands = 0 : i64, tpu.core_type = #tpu.core_type<tc>, window_params = [{transform_indices = @transform_0, window_bounds = array<i64: 1, 4, 256>}, {transform_indices = @transform_1, window_bounds = array<i64: 1, 4, 256>}]} {
    %c0 = arith.constant 0 : index
    %c0_0 = arith.constant 0 : index
    %c0_1 = arith.constant 0 : index
    %0 = vector.load %arg2[%c0, %c0_0, %c0_1] : memref<1x4x256xf32, #tpu.memory_space<vmem>>, vector<1x4x256xf32>
    %1 = arith.mulf %0, %0 : vector<1x4x256xf32>
    %cst = arith.constant dense<0.000000e+00> : vector<1x256xf32>
    %2 = vector.multi_reduction <add>, %1, %cst [1] : vector<1x4x256xf32> to vector<1x256xf32>
    %3 = vector.shape_cast %2 : vector<1x256xf32> to vector<1x1x256xf32>
    %4 = math.rsqrt %3 : vector<1x1x256xf32>
    %5 = vector.broadcast %4 : vector<1x1x256xf32> to vector<1x4x256xf32>
    %6 = arith.mulf %0, %5 : vector<1x4x256xf32>
    %c0_2 = arith.constant 0 : index
    %c0_3 = arith.constant 0 : index
    %c0_4 = arith.constant 0 : index
    %7 = vector.load %arg3[%c0_2, %c0_3, %c0_4] : memref<1x4x256xf32, #tpu.memory_space<vmem>>, vector<1x4x256xf32>
    tpu.vector_store %arg3[%c0_2, %c0_3, %c0_4], %6 {strides = array<i32>} : memref<1x4x256xf32, #tpu.memory_space<vmem>>, vector<1x4x256xf32>,
    return
  }
  func.func @transform_0(%arg0: i32, %arg1: i32) -> (i32, i32, i32) {
    %c0_i32 = arith.constant 0 : i32
    %c0_i32_0 = arith.constant 0 : i32
    return %arg0, %c0_i32, %arg1 : i32, i32, i32
  }
  func.func @transform_1(%arg0: i32, %arg1: i32) -> (i32, i32, i32) {
    %c0_i32 = arith.constant 0 : i32
    %c0_i32_0 = arith.constant 0 : i32
    return %arg0, %c0_i32, %arg1 : i32, i32, i32
  }
}

</mosaic_0001>

<bundles_post_ra>
// kernel: tpu_custom_call.1
= control target key start
LH: loop header
LB: loop body
LE: loop exit
PB: predicated region body
PF: predicated region fallthrough
CT: control target
= control target key end

     0   :  { %6 = vsyncpa [#allocation3], 0  ;;  %s663_s0 = inlined_call_operand.hbm [shape: f32[2,4,256], index: 0, kind: input, shape index: {}]   ;;  %s664_s1 = inlined_call_operand.hbm [shape: f32[2,4,256], index: 1, kind: output, shape index: {}]  }
   0x1   :  { %8 = vsyncpa [#allocation3 + $0x1], 0 }
   0x2   :  { %9 = vsyncpa [#allocation4], 0 }
   0x3   :  { %11 = vsyncpa [#allocation4 + $0x1], 0  ;;  %s491_s6 = smov 0   ;;  %s493_s7 = smov 0  }
   0x4   :  { %s495_s8 = smov 0   ;;  %s497_s9 = smov 0  }
   0x5   :  { %s499_s10 = smov 0   ;;  %s501_s11 = smov 0  }
   0x6 LB: > { %s282_s12 = sadd.s32 4294967295, %s477_s11   ;;  %s283_s13 = sadd.s32 4294967294, %s477_s11   ;;  %s477_s11 = sphi %s501_s11, %s17_s11   ;;  %s473_s10 = sphi %s499_s10, %s680_s10   ;;  %s469_s9 = sphi %s497_s9, %s679_s9   ;;  %s465_s8 = sphi %s495_s8, %s678_s8   ;;  %s461_s7 = sphi %s493_s7, %s677_s7   ;;  %s457_s6 = sphi %s491_s6, %s676_s6  }
   0x7   : > { %s29_s14 = sadd.s32 1, %s473_s10  ;;  %s38_s15 = sadd.s32 1, %s465_s8 }
   0x8   : > { %p31_p0 = scmp.ge.s32.totalorder %s29_s14, 2  ;;  %p45_p1 = scmp.ne.s32.totalorder %s465_s8, %s461_s7 }
   0x9   : > { %p46_p2 = scmp.eq.s32.totalorder %s477_s11, 0  ;;  %p51_p3 = scmp.ne.s32.totalorder %s461_s7, %s457_s6 }
   0xa   : > { %s682_s14 = smov (%p31_p0, %s29_s14), 0  ;;  %p52_p5 = scmp.eq.s32.totalorder %s282_s12, 0 }
   0xb   : > { %p532_p4 = por %p46_p2, %p45_p1  ;;  %s33_s17 = ssub.s32 %s473_s10, %s682_s14 }
   0xc   : > { %p77_p6 = scmp.eq.s32.totalorder %s282_s12, 1  ;;  %p36_p7 = scmp.eq.s32.totalorder %s33_s17, 0 }
   0xd   : > { %p538_p8 = por %p52_p5, %p51_p3  ;;  %p83_p10 = scmp.eq.s32.totalorder %s283_s13, 1 }
   0xe   : > { %p542_p9 = por %p77_p6, %p45_p1  ;;  %p311_p13 = scmp.lt.s32.totalorder %s477_s11, 2 }
   0xf   : > { %s547_s20 = scalar_select %p36_p7, %s465_s8, %s38_s15  }
  0x10   : > { %s668_s19 = scalar_select %p542_p9, 1, 0 }
  0x11   : > { %p549_p11 = por %p83_p10, %p51_p3  ;;  %s103_s22 = sand.u32 1, %s465_s8  }
  0x12   : > { %s286_s23 = sshll.u32 %s103_s22, 3  ;;  %s297_s24 = sshll.u32 %s473_s10, 7 }
  0x13   : > { %s669_s21 = scalar_select %p549_p11, 1, 0 }
  0x14   : > { %s560_s27 = scalar_lea.hbm %s663_s0, %s297_s24  ;;  %s107_s28 = scalar_lea.vmem [#allocation2], %s286_s23 }
  0x15   : > { %s117_s29 = sshll.u32 %s107_s28, 4  ;;  %p566_p0 = pnand %p311_p13, %p532_p4  ;;  %s562_s29 = int_to_ptr.vmem [resolvable:$true] %s117_s29 }
  0x16   : > { %s104_s2 = scalar_lea.sflag [#allocation3], %s103_s22  ;;  %s365_s3 = scalar_lea.hbm %s560_s27, 128 }
  0x17   : > { %p366_p3 = scmp.ne.s32.totalorder %s560_s27, %s365_s3  ;;  %p367_p5 = pneg %p566_p0 }
  0x18   : > { %s370_s12 = scalar_lea.hbm %s663_s0, 256  ;;  %p371_p4 = scmp.lt.u32.totalorder %s560_s27, %s663_s0 }
  0x19   : > { %p368_p6 = pnand %p367_p5, %p366_p3  ;;  %p372_p10 = scmp.lt.u32.totalorder %s370_s12, %s365_s3 }
  0x1a   : > { %p374_p12 = scmp.lt.u32.totalorder %s365_s3, %s560_s27 }
  0x1b   : > { %p369_p7 = pneg %p368_p6  ;;  %p373_p13 = por %p372_p10, %p371_p4 }
  0x1d   : > { %p375_p1 = por %p374_p12, %p373_p13 }
  0x1f   : > { %p376_p2 = pnand %p375_p1, %p369_p7 }
  0x21   : > { %379 = shalt.err (!%p376_p2)
}
  0x22   : > { %s380_s16 = scalar_lea.vmem %s562_s29, 128  ;;  %s479_s17 = smov [#allocation2]  }
  0x23   : > { %p381_p3 = scmp.ne.s32.totalorder %s562_s29, %s380_s16  ;;  %s385_s22 = sshll.u32 %s479_s17, 4  ;;  %s386_s22 = int_to_ptr.vmem [resolvable:$false] %s385_s22 }
  0x24   : > { %s387_s23 = scalar_lea.vmem %s386_s22, 256  ;;  %p388_p9 = scmp.lt.s32.totalorder %s562_s29, %s386_s22 }
  0x25   : > { %p383_p6 = pnand %p381_p3, %p367_p5  ;;  %p389_p4 = scmp.lt.s32.totalorder %s387_s23, %s380_s16 }
  0x27   : > { %p384_p11 = pneg %p383_p6  ;;  %p390_p10 = por %p389_p4, %p388_p9 }
  0x29   : > { %p391_p12 = pnand %p390_p10, %p384_p11 }
  0x2b   : > { %394 = shalt.err (!%p391_p12)
}
  0x2c   : > { %306 = dma.hbm_to_vmem [thread:$0]  (!%p566_p0), %s560_s27, 128, %s562_s29, %s104_s2  }
  0x2d   : > { %p671_p1 = scmp.lt.s32.totalorder %s477_s11, 3  ;;  %p672_p2 = scmp.ge.s32.totalorder %s477_s11, 1 }
  0x2f   : > { %p123_p5 = pnand %p672_p2, %p671_p1 }
  0x30   : > { %s602_s24 = sand.u32 (!%p123_p5), 1, %s461_s7  }
  0x31   : > { %126 = sbr.rel (%p123_p5) target bundleno = 104 (0x68), region = 24  ;;  %s290_s25 = sshll.u32 (!%p123_p5), %s602_s24, 3 }
  0x32   : > { %s129_s26 = scalar_lea.sflag (!%p123_p5), [#allocation3], %s602_s24  ;;  %s132_s28 = scalar_lea.vmem (!%p123_p5), [#allocation2], %s290_s25 }
  0x38   : > { %448 = dma.done.wait (%p538_p8), %s129_s26, 128  }
  0x39   : > { %450 = vsyncadd (%p538_p8), %s129_s26, 4294967168  ;;  %v153_v0 = vld [vmem:[%s132_s28] sm:$0xff]  ;;  %vm158_vm0 = vcmask 1043456   ;;  %s150_s18 = scalar_lea.vmem [#allocation5], %s290_s25  ;;  %s298_s29 = sshll.u32 %s469_s9, 7 }
  0x3a   : > { %v154_v1 = vmul.f32 %v153_v0, %v153_v0  ;;  %s198_s27 = sshll.u32 %s150_s18, 4  ;;  %s616_s3 = scalar_lea.hbm %s664_s1, %s298_s29  ;;  %s611_s27 = int_to_ptr.vmem [resolvable:$true] %s198_s27 }
  0x3b   : > { %s182_s4 = scalar_lea.sflag [#allocation4], %s602_s24  ;;  %s395_s5 = scalar_lea.vmem %s611_s27, 128 }
  0x3c   : > { %v156_v2 = vcombine.high %v154_v1, %v154_v1  ;;  %v159_v3 = vsel %vm158_vm0, %v154_v1, 0.0  ;;  %p396_p8 = scmp.ne.s32.totalorder %s611_s27, %s395_s5  ;;  %p673_p9 = scmp.ne.s32.totalorder %s668_s19, 0 }
  0x3d   : > { %v160_v4 = vrot.slane %v159_v3, 4  ;;  %s480_s9 = smov [#allocation5]  }
  0x3e   : > { %v166_v5 = vsel %vm158_vm0, %v156_v2, 0.0  ;;  %p397_p11 = pnand %p396_p8, %p673_p9  ;;  %s399_s12 = sshll.u32 %s480_s9, 4  ;;  %s400_s12 = int_to_ptr.vmem [resolvable:$false] %s399_s12 }
  0x3f   : > { %v161_v6 = vadd.f32 %v160_v4, %v159_v3  ;;  %v167_v7 = vrot.slane %v166_v5, 4  ;;  %s401_s13 = scalar_lea.vmem %s400_s12, 256  ;;  %p402_p7 = scmp.lt.s32.totalorder %s611_s27, %s400_s12 }
  0x40   : > { %p398_p0 = pneg %p397_p11  ;;  %p403_p13 = scmp.lt.s32.totalorder %s401_s13, %s395_s5 }
  0x41   : > { %v162_v8 = vrot.slane %v161_v6, 2  ;;  %v168_v9 = vadd.f32 %v167_v7, %v166_v5 }
  0x42   : > { %p404_p3 = por %p403_p13, %p402_p7 }
  0x43   : > { %v163_v10 = vadd.f32 %v162_v8, %v161_v6  ;;  %v169_v11 = vrot.slane %v168_v9, 2 }
  0x44   : > { %p405_p6 = pnand %p404_p3, %p398_p0 }
  0x45   : > { %v164_v12 = vrot.slane %v163_v10, 1  ;;  %v170_v13 = vadd.f32 %v169_v11, %v168_v9 }
  0x47   : > { %v165_v14 = vadd.f32 %v164_v12, %v163_v10  ;;  %v171_v15 = vrot.slane %v170_v13, 1 }
  0x49   : > { %v172_v16 = vadd.f32 %v171_v15, %v170_v13  ;;  %361 = vrsqrt.f32 %v165_v14 }
  0x4b   : > { %363 = vrsqrt.f32 %v172_v16 }
  0x53   : > { %v362_v17 = vpop.eup %361 }
  0x55   : > { %v364_v18 = vpop.eup %363 }
  0x56   : > { %v177_v19 = vcombine.low %v362_v17, %v364_v18 }
  0x58   : > { %v179_v20 = vmul.f32 %v177_v19, %v153_v0 }
  0x5a   : > { %180 = vst [vmem:[%s150_s18] sm:$0xff] %v179_v20 }
  0x5b   : > { %408 = shalt.err (!%p405_p6)
}
  0x5c   : > { %s409_s15 = scalar_lea.hbm %s616_s3, 128  ;;  %s413_s22 = scalar_lea.hbm %s664_s1, 256 }
  0x5d   : > { %p410_p4 = scmp.ne.s32.totalorder %s616_s3, %s409_s15  ;;  %p414_p1 = scmp.lt.u32.totalorder %s616_s3, %s664_s1 }
  0x5e   : > { %p415_p2 = scmp.lt.u32.totalorder %s413_s22, %s409_s15  ;;  %p417_p8 = scmp.lt.u32.totalorder %s409_s15, %s616_s3 }
  0x5f   : > { %p411_p10 = pnand %p410_p4, %p673_p9 }
  0x60   : > { %p416_p5 = por %p415_p2, %p414_p1 }
  0x61   : > { %p412_p12 = pneg %p411_p10 }
  0x62   : > { %p418_p11 = por %p417_p8, %p416_p5 }
  0x64   : > { %p419_p0 = pnand %p418_p11, %p412_p12 }
  0x66   : > { %422 = shalt.err (!%p419_p0)
}
  0x67   : > { %301 = dma.vmem_to_hbm [thread:$0]  (%p673_p9), %s611_s27, 128, %s616_s3, %s182_s4  }
  0x68 PF: > { %s210_s25 = sand.u32 1, %s457_s6   ;;  %p674_p7 = scmp.ne.s32.totalorder %s669_s21, 0 }
  0x69   : > { %p675_p13 = scmp.ge.s32.totalorder %s477_s11, 2  ;;  %s211_s26 = scalar_lea.sflag [#allocation4], %s210_s25 }
  0x6b   : > { %p308_p3 = pnand %p675_p13, %p674_p7 }
  0x6d   : > { %452 = dma.done.wait (!%p308_p3), %s211_s26, 128  }
  0x6e   : > { %454 = vsyncadd (!%p308_p3), %s211_s26, 4294967168  ;;  %s17_s11 = sadd.s32 1, %s477_s11   ;;  %s676_s6 = smov %s461_s7 }
  0x6f   : > { %p14_p6 = scmp.ge.s32.totalorder %s17_s11, 4   ;;  %s677_s7 = smov %s465_s8 }
  0x70   : > { %s678_s8 = smov %s547_s20  ;;  %s679_s9 = smov %s473_s10 }
  0x71   : > { %s680_s10 = smov %s682_s14  ;;  %16 = sbr.rel (!%p14_p6) target bundleno = 6 (0x6), region = 69 }
  0x78   :  { %216 = vsyncpa [#allocation3], 1 }
  0x79   :  { %218 = vsyncpa [#allocation3 + $0x1], 1 }
  0x7a   :  { %219 = vsyncpa [#allocation4], 1 }
  0x7b   :  { %221 = vsyncpa [#allocation4 + $0x1], 1 }

</bundles_post_ra>
